<compile_context>
chip_gen: v7x
topology: tpu7x:2x2x1
jax: 0.10.0
libtpu: 0.0.40
codegen_flags: <defaults>
</compile_context>

<pallas_src>
import functools

import jax
import jax.numpy as jnp
from jax import lax
from jax.experimental import pallas as pl
from jax.experimental.pallas import tpu as pltpu


def _w2v_partial_kernel(y_pred_ref, y_true_ref, sum_ref, cnt_ref, *,
                        total_rows: int, block_rows: int):
    """Per-block partials: sum(log(y_pred)[mask]) and sum(mask)."""
    y = y_pred_ref[...]          # (TB, V) f32 probabilities
    m = y_true_ref[...]          # (TB, V) bool neighbor mask

    if total_rows % block_rows != 0:
        # Ragged last block: rows past `total_rows` contain unspecified data;
        # mask them out (total_rows / block_rows are static, program_id is not).
        pid = pl.program_id(0)
        row_ids = pid * block_rows + lax.broadcasted_iota(
            jnp.int32, (block_rows, 1), 0)
        m = jnp.logical_and(m, row_ids < total_rows)

    logp = jnp.log(y)
    # Select, not multiply: 0 * (-inf/NaN) would poison the sum.
    masked_log = jnp.where(m, logp, jnp.zeros_like(logp))
    total = jnp.sum(masked_log)
    count = jnp.sum(m.astype(jnp.float32))

    # Lane-dense, fully (8,128)-aligned partial outputs (scalar splatted so the
    # store is an unmasked full-tile vst).
    sum_ref[...] = jnp.full(sum_ref.shape, total, dtype=jnp.float32)
    cnt_ref[...] = jnp.full(cnt_ref.shape, count, dtype=jnp.float32)


def _pick_block_rows(n_rows: int, n_cols: int,
                     target_block_bytes: int = 4 * 1024 * 1024) -> int:
    """Rows per block: ~4 MiB of f32 per input buffer, multiple of 32 (so the
    bool block is also natively tileable), capped at the full batch."""
    rows = max(32, (target_block_bytes // (n_cols * 4)) // 32 * 32)
    return min(rows, n_rows)


def word2vec_loss(y_pred: jax.Array, y_true: jax.Array) -> jax.Array:
    """Pallas equivalent of Word2vecLoss.forward.

    y_pred: [B, V] float32 probabilities, y_true: [B, V] bool neighbor mask.
    Returns a scalar float32.
    """
    assert y_pred.shape == y_true.shape and y_pred.ndim == 2
    B, V = y_pred.shape
    y_pred = y_pred.astype(jnp.float32)
    y_true = y_true.astype(jnp.bool_)   # no-op if already bool; stays 1 B/elem

    TB = _pick_block_rows(B, V)
    grid_n = pl.cdiv(B, TB)

    kernel = functools.partial(_w2v_partial_kernel,
                               total_rows=B, block_rows=TB)

    sums, cnts = pl.pallas_call(
        kernel,
        out_shape=(
            jax.ShapeDtypeStruct((grid_n * 8, 128), jnp.float32),  # partial sums
            jax.ShapeDtypeStruct((grid_n * 8, 128), jnp.float32),  # partial counts
        ),
        grid=(grid_n,),
        in_specs=[
            pl.BlockSpec((TB, V), lambda i: (i, 0)),
            pl.BlockSpec((TB, V), lambda i: (i, 0)),
        ],
        out_specs=(
            pl.BlockSpec((8, 128), lambda i: (i, 0)),
            pl.BlockSpec((8, 128), lambda i: (i, 0)),
        ),
        compiler_params=pltpu.CompilerParams(
            # Blocks are independent partials -> parallel (lets v7x use both TCs).
            dimension_semantics=("parallel",),
        ),
        cost_estimate=pl.CostEstimate(
            flops=3 * B * V,
            transcendentals=B * V,
            bytes_accessed=B * V * 4 + B * V * 1 + 2 * grid_n * 8 * 128 * 4,
        ),
    )(y_pred, y_true)

    # Tiny O(grid) finalize in plain JAX: one representative lane per block.
    partial_sums = sums.reshape(grid_n, 8, 128)[:, 0, 0]
    partial_cnts = cnts.reshape(grid_n, 8, 128)[:, 0, 0]
    total = jnp.sum(partial_sums)
    count = jnp.sum(partial_cnts)
    # count == 0 -> NaN, same as PyTorch's mean over an empty masked_select.
    return -(total / count)


def _reference(y_pred, y_true):
    sel = jnp.where(y_true, jnp.log(y_pred), 0.0)
    return -(jnp.sum(sel) / jnp.sum(y_true.astype(jnp.float32)))


if __name__ == "__main__":
    key = jax.random.PRNGKey(0)

    # Case 1: small shape matching the module (batch=8, vocab/GO terms=256);
    # single block, grid=1.
    kp, km, kp2, km2 = jax.random.split(key, 4)
    B1, V1 = 8, 256
    y_pred1 = jax.random.uniform(kp, (B1, V1), dtype=jnp.float32,
                                 minval=1e-3, maxval=1.0)
    y_true1 = jax.random.bernoulli(km, p=0.25, shape=(B1, V1))
    y_true1 = y_true1.at[0, 0].set(True)   # ensure at least one selected element

    loss1 = word2vec_loss(y_pred1, y_true1)
    jax.block_until_ready(loss1)
    ref1 = _reference(y_pred1, y_true1)
    assert jnp.allclose(loss1, ref1, rtol=1e-5, atol=1e-5), (loss1, ref1)

    # Case 2: exercises the tiled / ragged-last-block path (B=40, TB=32 -> grid=2).
    B2, V2 = 40, 256
    y_pred2 = jax.random.uniform(kp2, (B2, V2), dtype=jnp.float32,
                                 minval=1e-3, maxval=1.0)
    y_true2 = jax.random.bernoulli(km2, p=0.25, shape=(B2, V2))
    y_true2 = y_true2.at[0, 0].set(True)

    loss2 = word2vec_loss(y_pred2, y_true2)
    jax.block_until_ready(loss2)
    ref2 = _reference(y_pred2, y_true2)
    assert jnp.allclose(loss2, ref2, rtol=1e-5, atol=1e-5), (loss2, ref2)

    print("KERNEL_OK")
</pallas_src>

<mosaic_0001>
module attributes {stable_mosaic.version = 11 : i64} {
  func.func @_w2v_partial_kernel(%arg0: i32, %arg1: memref<8x256xf32, #tpu.memory_space<vmem>>, %arg2: memref<8x256xi32, #tpu.memory_space<vmem>>, %arg3: memref<8x128xf32, #tpu.memory_space<vmem>>, %arg4: memref<8x128xf32, #tpu.memory_space<vmem>>) attributes {dimension_semantics = [#tpu.dimension_semantics<parallel>], iteration_bounds = array<i64: 1>, scalar_prefetch = 0 : i64, scratch_operands = 0 : i64, tpu.core_type = #tpu.core_type<tc>, window_params = [{transform_indices = @transform_0, window_bounds = array<i64: 8, 256>}, {transform_indices = @transform_1, window_bounds = array<i64: 8, 256>}, {transform_indices = @transform_2, window_bounds = array<i64: 8, 128>}, {transform_indices = @transform_3, window_bounds = array<i64: 8, 128>}]} {
    %c0 = arith.constant 0 : index
    %c0_0 = arith.constant 0 : index
    %0 = vector.load %arg1[%c0, %c0_0] : memref<8x256xf32, #tpu.memory_space<vmem>>, vector<8x256xf32>
    %c0_1 = arith.constant 0 : index
    %c0_2 = arith.constant 0 : index
    %1 = vector.load %arg2[%c0_1, %c0_2] : memref<8x256xi32, #tpu.memory_space<vmem>>, vector<8x256xi32>
    %cst = arith.constant dense<0> : vector<8x256xi32>
    %2 = arith.cmpi ne, %1, %cst : vector<8x256xi32>
    %3 = math.log %0 : vector<8x256xf32>
    %cst_3 = arith.constant 0.000000e+00 : f32
    %4 = vector.broadcast %cst_3 : f32 to vector<8x256xf32>
    %5 = arith.select %2, %3, %4 : vector<8x256xi1>, vector<8x256xf32>
    %6 = vector.shape_cast %5 : vector<8x256xf32> to vector<1x8x256xf32>
    %cst_4 = arith.constant dense<0.000000e+00> : vector<1xf32>
    %7 = vector.multi_reduction <add>, %6, %cst_4 [1, 2] : vector<1x8x256xf32> to vector<1xf32>
    %8 = vector.shape_cast %7 : vector<1xf32> to vector<1x1x1xf32>
    %9 = vector.extract %8[0, 0, 0] : f32 from vector<1x1x1xf32>
    %10 = arith.extui %2 : vector<8x256xi1> to vector<8x256xi32>
    %11 = arith.sitofp %10 : vector<8x256xi32> to vector<8x256xf32>
    %12 = vector.shape_cast %11 : vector<8x256xf32> to vector<1x8x256xf32>
    %cst_5 = arith.constant dense<0.000000e+00> : vector<1xf32>
    %13 = vector.multi_reduction <add>, %12, %cst_5 [1, 2] : vector<1x8x256xf32> to vector<1xf32>
    %14 = vector.shape_cast %13 : vector<1xf32> to vector<1x1x1xf32>
    %15 = vector.extract %14[0, 0, 0] : f32 from vector<1x1x1xf32>
    %16 = vector.broadcast %9 : f32 to vector<8x128xf32>
    %c0_6 = arith.constant 0 : index
    %c0_7 = arith.constant 0 : index
    %17 = vector.load %arg3[%c0_6, %c0_7] : memref<8x128xf32, #tpu.memory_space<vmem>>, vector<8x128xf32>
    tpu.vector_store %arg3[%c0_6, %c0_7], %16 {strides = array<i32>} : memref<8x128xf32, #tpu.memory_space<vmem>>, vector<8x128xf32>,
    %18 = vector.broadcast %15 : f32 to vector<8x128xf32>
    %c0_8 = arith.constant 0 : index
    %c0_9 = arith.constant 0 : index
    %19 = vector.load %arg4[%c0_8, %c0_9] : memref<8x128xf32, #tpu.memory_space<vmem>>, vector<8x128xf32>
    tpu.vector_store %arg4[%c0_8, %c0_9], %18 {strides = array<i32>} : memref<8x128xf32, #tpu.memory_space<vmem>>, vector<8x128xf32>,
    return
  }
  func.func @transform_0(%arg0: i32) -> (i32, i32) {
    %c0_i32 = arith.constant 0 : i32
    %c0_i32_0 = arith.constant 0 : i32
    return %arg0, %c0_i32 : i32, i32
  }
  func.func @transform_1(%arg0: i32) -> (i32, i32) {
    %c0_i32 = arith.constant 0 : i32
    %c0_i32_0 = arith.constant 0 : i32
    return %arg0, %c0_i32 : i32, i32
  }
  func.func @transform_2(%arg0: i32) -> (i32, i32) {
    %c0_i32 = arith.constant 0 : i32
    %c0_i32_0 = arith.constant 0 : i32
    return %arg0, %c0_i32 : i32, i32
  }
  func.func @transform_3(%arg0: i32) -> (i32, i32) {
    %c0_i32 = arith.constant 0 : i32
    %c0_i32_0 = arith.constant 0 : i32
    return %arg0, %c0_i32 : i32, i32
  }
}

</mosaic_0001>

<bundles_post_ra>
// kernel: tpu_custom_call.1
= control target key start
LH: loop header
LB: loop body
LE: loop exit
PB: predicated region body
PF: predicated region fallthrough
CT: control target
= control target key end

     0   :  { %9 = vsyncpa [#allocation3], 0  ;;  %s203_s0 = inlined_call_operand.vmem [shape: f32[8,256], index: 0, kind: input, shape index: {}]   ;;  %s204_s1 = inlined_call_operand.vmem [shape: s32[8,256], index: 1, kind: input, shape index: {}]   ;;  %s205_s2 = inlined_call_operand.hbm [shape: f32[8,128], index: 2, kind: output, shape index: {0}]   ;;  %s206_s3 = inlined_call_operand.hbm [shape: f32[8,128], index: 3, kind: output, shape index: {1}]  }
   0x1   :  { %v15_v0 = vld [vmem:[%s203_s0] sm:$0xff]  ;;  %v16_v1 = vld [vmem:[%s203_s0 + $0x8] sm:$0xff] }
   0x2   :  { %92 = vlog2.f32 %v15_v0 }
   0x3   :  { %10 = vsyncpa [#allocation5], 0  ;;  %94 = vlog2.f32 %v16_v1  ;;  %v17_v2 = vld [vmem:[%s204_s1] sm:$0xff]  ;;  %v18_v3 = vld [vmem:[%s204_s1 + $0x8] sm:$0xff]  ;;  %v144_v10 = vmov 0.0   ;;  %s145_s0 = smov [#allocation2]  }
   0x4   :  { %vm19_vm0 = vcmp.ne.s32.totalorder %v17_v2, 0  ;;  %vm20_vm1 = vcmp.ne.s32.totalorder %v18_v3, 0  ;;  %s61_s1 = sshll.u32 %s145_s0, 4  ;;  %s146_s21 = smov [#allocation4]   ;;  %s62_s1 = int_to_ptr.vmem [resolvable:$true] %s61_s1 }
   0x5   :  { %v83_v11 = vsel %vm19_vm0, 1.0, %v144_v10  ;;  %v84_v12 = vsel %vm20_vm1, 1.0, %v144_v10  ;;  %s71_s22 = sshll.u32 %s146_s21, 4  ;;  %s96_s23 = scalar_lea.vmem %s62_s1, 128  ;;  %s72_s22 = int_to_ptr.vmem [resolvable:$true] %s71_s22 }
   0x6   :  { %v41_v14 = vadd.f32 %v84_v12, %v83_v11  ;;  %p97_p0 = scmp.ne.s32.totalorder %s62_s1, %s96_s23  ;;  %p101_p1 = scmp.lt.s32.totalorder %s62_s1, %s62_s1 }
   0x7   :  { %p102_p2 = scmp.lt.s32.totalorder %s96_s23, %s96_s23 }
   0x9   :  { %p103_p3 = por %p102_p2, %p101_p1 }
   0xb   :  { %p104_p4 = pnand %p103_p3, %p97_p0 }
   0xc   :  { %v93_v4 = vpop.eup %92 }
   0xd   :  { %v95_v5 = vpop.eup %94  ;;  %v22_v6 = vmul.f32 0.6931472, %v93_v4 }
   0xe   :  { %v24_v7 = vmul.f32 0.6931472, %v95_v5 }
   0xf   :  { %v25_v8 = vsel %vm19_vm0, %v22_v6, 0.0 }
  0x10   :  { %v26_v9 = vsel %vm20_vm1, %v24_v7, 0.0 }
  0x11   :  { %v27_v13 = vadd.f32 %v26_v9, %v25_v8 }
  0x13   :  { %28 = vadd.xlane.f32.xlu0 %v27_v13 }
  0x17   :  { %42 = vadd.xlane.f32.xlu0 %v41_v14 }
  0xa0   :  { %v29_v15 = vpop.xlane.xlu0 %28 }
  0xa1   :  { %v30_v16 = vrot.slane %v29_v15, 4 }
  0xa3   :  { %v31_v17 = vadd.f32 %v30_v16, %v29_v15 }
  0xa4   :  { %v43_v18 = vpop.xlane.xlu0 %42 }
  0xa5   :  { %v32_v19 = vrot.slane %v31_v17, 2  ;;  %v44_v20 = vrot.slane %v43_v18, 4 }
  0xa7   :  { %v45_v21 = vadd.f32 %v44_v20, %v43_v18  ;;  %v33_v22 = vadd.f32 %v32_v19, %v31_v17 }
  0xa9   :  { %v46_v23 = vrot.slane %v45_v21, 2  ;;  %v34_v24 = vrot.slane %v33_v22, 1 }
  0xab   :  { %v47_v25 = vadd.f32 %v46_v23, %v45_v21  ;;  %v35_v26 = vadd.f32 %v34_v24, %v33_v22 }
  0xad   :  { %85 = vpush %v35_v26  ;;  %v48_v27 = vrot.slane %v47_v25, 1 }
  0xaf   :  { %v49_v28 = vadd.f32 %v48_v27, %v47_v25 }
  0xb1   :  { %87 = vpush %v49_v28 }
  0xde   :  { %s86_s20 = spop %85 }
  0xdf   :  { %v51_v29 = vstv %s86_s20 }
  0xe0   :  { %52 = vst [vmem:[#allocation2] sm:$0xff] %v51_v29 }
  0xe1   :  { %107 = shalt.err (!%p104_p4)
}
  0xe2   :  { %s108_s26 = scalar_lea.hbm %s205_s2, 128 }
  0xe3   :  { %p109_p5 = scmp.ne.s32.totalorder %s205_s2, %s108_s26  ;;  %p112_p6 = scmp.lt.u32.totalorder %s108_s26, %s205_s2 }
  0xe5   :  { %p114_p7 = pnand %p112_p6, %p109_p5 }
  0xe7   :  { %117 = shalt.err (!%p114_p7)
}
  0xe8   :  { %64 = dma.vmem_to_hbm [thread:$0]  %s62_s1, 128, %s205_s2, [#allocation3]  }
  0xe9   :  { %s88_s6 = spop %87  ;;  %s118_s7 = scalar_lea.vmem %s72_s22, 128 }
  0xea   :  { %v53_v30 = vstv %s88_s6  ;;  %p119_p8 = scmp.ne.s32.totalorder %s72_s22, %s118_s7  ;;  %p123_p9 = scmp.lt.s32.totalorder %s72_s22, %s72_s22 }
  0xeb   :  { %54 = vst [vmem:[#allocation4] sm:$0xff] %v53_v30  ;;  %p124_p10 = scmp.lt.s32.totalorder %s118_s7, %s118_s7 }
  0xed   :  { %p125_p11 = por %p124_p10, %p123_p9 }
  0xef   :  { %p126_p12 = pnand %p125_p11, %p119_p8 }
  0xf1   :  { %129 = shalt.err (!%p126_p12)
}
  0xf2   :  { %s130_s10 = scalar_lea.hbm %s206_s3, 128 }
  0xf3   :  { %p131_p13 = scmp.ne.s32.totalorder %s206_s3, %s130_s10  ;;  %p134_p0 = scmp.lt.u32.totalorder %s130_s10, %s206_s3 }
  0xf5   :  { %p136_p1 = pnand %p134_p0, %p131_p13 }
  0xf7   :  { %139 = shalt.err (!%p136_p1)
}
  0xf8   :  { %74 = dma.vmem_to_hbm [thread:$0]  %s72_s22, 128, %s206_s3, [#allocation5]  }
  0xf9   :  { %140 = dma.done.wait [#allocation3], 128  }
  0xfa   :  { %141 = vsyncadd [#allocation3], 4294967168 }
  0xfb   :  { %142 = dma.done.wait [#allocation5], 128  }
  0xfc   :  { %143 = vsyncadd [#allocation5], 4294967168 }
  0xfd   :  { %81 = vsyncpa [#allocation3], 1 }
  0xfe   :  { %82 = vsyncpa [#allocation5], 1 }

</bundles_post_ra>
